<compile_context>
chip_gen: v7x
topology: tpu7x:2x2x1
jax: 0.10.0
libtpu: 0.0.40
codegen_flags: <defaults>
</compile_context>

<pallas_src>
import math
import functools

import jax
import jax.numpy as jnp
from jax.experimental import pallas as pl
from jax.experimental.pallas import tpu as pltpu


# ----------------------------------------------------------------------------
# Kernel: one grid step = (batch block b, encoder layer l); decoder projection
# runs under pl.when(l == L-1).
# ----------------------------------------------------------------------------
def _transformer_kernel(
    x_ref,                                   # (1, S, E)  f32  embed*sqrt(E)+PE
    wqkv_ref, bqkv_ref,                      # (1, E, 3E) bf16, (1, 1, 3E) f32
    wo_ref, bo_ref,                          # (1, E, E)  bf16, (1, 1, E)  f32
    w1_ref, b1_ref,                          # (1, E, F)  bf16, (1, 1, F)  f32
    w2_ref, b2_ref,                          # (1, F, E)  bf16, (1, 1, E)  f32
    ln1_g_ref, ln1_b_ref, ln2_g_ref, ln2_b_ref,   # (1, 1, E) f32
    dec_w_ref, dec_b_ref,                    # (E, Vp) bf16, (1, Vp) f32
    o_ref,                                   # (1, S, Vp) f32
    x_scr,                                   # VMEM (S, E) f32 residual stream
    *, num_heads, eps=1e-5,
):
    l = pl.program_id(1)
    last = pl.num_programs(1) - 1
    S, E = x_scr.shape
    Dh = E // num_heads
    scale = 1.0 / math.sqrt(Dh)
    bf16 = jnp.bfloat16

    @pl.when(l == 0)
    def _():
        x_scr[...] = x_ref[0]                # load embed+PE for this batch row

    def layer_norm(h, g, b):
        mu = jnp.mean(h, axis=-1, keepdims=True)
        var = jnp.mean((h - mu) ** 2, axis=-1, keepdims=True)
        return (h - mu) * jax.lax.rsqrt(var + eps) * g + b

    x = x_scr[...]                           # (S, E) f32
    x_bf = x.astype(bf16)                    # single cast, reused as MXU LHS

    # ---------------- fused QKV projection (one MXU pass, 3E lanes) ----------
    qkv = jnp.dot(x_bf, wqkv_ref[0], preferred_element_type=jnp.float32)
    qkv = qkv + bqkv_ref[0]                  # (S, 3E)

    # ---------------- multi-head self attention ------------------------------
    # attn_out = concat_h(softmax(q_h k_h^T / sqrt(Dh)) v_h) @ W_o is computed
    # as sum_h o_h @ W_o[h*Dh:(h+1)*Dh, :]  (no concatenate, no lane masks).
    attn = jnp.zeros((S, E), jnp.float32)
    for h in range(num_heads):               # static unroll, tiny per-head ops
        q_h = qkv[:, h * Dh:(h + 1) * Dh].astype(bf16)
        k_h = qkv[:, E + h * Dh:E + (h + 1) * Dh].astype(bf16)
        v_h = qkv[:, 2 * E + h * Dh:2 * E + (h + 1) * Dh].astype(bf16)
        s_h = jax.lax.dot_general(q_h, k_h, (((1,), (1,)), ((), ())),
                                  preferred_element_type=jnp.float32) * scale
        s_h = s_h - jnp.max(s_h, axis=-1, keepdims=True)
        p_h = jnp.exp(s_h)
        p_h = p_h / jnp.sum(p_h, axis=-1, keepdims=True)      # exact softmax
        o_h = jnp.dot(p_h.astype(bf16), v_h,
                      preferred_element_type=jnp.float32)     # (S, Dh)
        attn = attn + jnp.dot(o_h.astype(bf16),
                              wo_ref[0, h * Dh:(h + 1) * Dh, :],
                              preferred_element_type=jnp.float32)
    attn = attn + bo_ref[0]

    x = layer_norm(x + attn, ln1_g_ref[0], ln1_b_ref[0])

    # ---------------- feed forward (ReLU) -------------------------------------
    x_bf = x.astype(bf16)
    f = jnp.dot(x_bf, w1_ref[0], preferred_element_type=jnp.float32) + b1_ref[0]
    f = jnp.maximum(f, 0.0)
    f = jnp.dot(f.astype(bf16), w2_ref[0],
                preferred_element_type=jnp.float32) + b2_ref[0]
    x = layer_norm(x + f, ln2_g_ref[0], ln2_b_ref[0])

    x_scr[...] = x                            # keep residual stream VMEM-resident

    # ---------------- vocab projection (lane-dense, padded V) -----------------
    @pl.when(l == last)
    def _():
        o_ref[0] = (jnp.dot(x.astype(bf16), dec_w_ref[...],
                            preferred_element_type=jnp.float32)
                    + dec_b_ref[...])


# ----------------------------------------------------------------------------
# Wrapper: single pallas_call over grid=(B, L)
# ----------------------------------------------------------------------------
def transformer_forward(src, params, pe, *, num_heads):
    S, B = src.shape
    V, E = params["embedding"].shape
    L = params["wqkv"].shape[0]
    F = params["w1"].shape[2]
    Vp = params["dec_w"].shape[1]
    Dh = E // num_heads

    # glue: embedding gather * sqrt(E) + positional encoding -> (B, S, E)
    x = params["embedding"][src] * jnp.sqrt(jnp.float32(E)) + pe[:S]   # (S,B,E)
    x = jnp.transpose(x, (1, 0, 2))                                    # (B,S,E)

    # ---- advisory cost estimate for the whole fused model ----
    M = B * S
    flops = (2 * M * E * (3 * E + E + 2 * F) * L          # QKV + Wo + FFN
             + 4 * L * B * num_heads * S * S * Dh         # QK^T and P@V
             + 2 * M * E * Vp)                            # decoder
    transcendentals = L * B * num_heads * S * S + 4 * L * M
    bytes_accessed = int(sum(int(a.size) * a.dtype.itemsize
                             for a in params.values()) * B
                         + int(x.size) * 4 + M * Vp * 4)

    # ---- VMEM budget ~ a few x the per-step working set (double-buffered) ----
    blk = (2 * S * E * 4 + S * Vp * 4                      # x block, scratch, out
           + 2 * (3 * E * E + E * E + 2 * E * F)           # bf16 layer weights
           + 4 * (3 * E + 2 * E + F + 4 * E)               # biases + LN params
           + 2 * E * Vp + 4 * Vp)                          # decoder weights/bias
    vmem_limit = int(min(64 * 1024 * 1024, max(8 * 1024 * 1024, 8 * blk)))

    layer_w = lambda b, l: (l, 0, 0)          # per-layer weight blocks
    const2 = lambda b, l: (0, 0)              # decoder weights (loaded once)
    per_b = lambda b, l: (b, 0, 0)            # per-batch activation / output

    out = pl.pallas_call(
        functools.partial(_transformer_kernel, num_heads=num_heads),
        grid=(B, L),
        in_specs=[
            pl.BlockSpec((1, S, E), per_b),
            pl.BlockSpec((1, E, 3 * E), layer_w),
            pl.BlockSpec((1, 1, 3 * E), layer_w),
            pl.BlockSpec((1, E, E), layer_w),
            pl.BlockSpec((1, 1, E), layer_w),
            pl.BlockSpec((1, E, F), layer_w),
            pl.BlockSpec((1, 1, F), layer_w),
            pl.BlockSpec((1, F, E), layer_w),
            pl.BlockSpec((1, 1, E), layer_w),
            pl.BlockSpec((1, 1, E), layer_w),
            pl.BlockSpec((1, 1, E), layer_w),
            pl.BlockSpec((1, 1, E), layer_w),
            pl.BlockSpec((1, 1, E), layer_w),
            pl.BlockSpec((E, Vp), const2),
            pl.BlockSpec((1, Vp), const2),
        ],
        out_specs=pl.BlockSpec((1, S, Vp), per_b),
        out_shape=jax.ShapeDtypeStruct((B, S, Vp), jnp.float32),
        scratch_shapes=[pltpu.VMEM((S, E), jnp.float32)],
        compiler_params=pltpu.CompilerParams(
            dimension_semantics=("parallel", "arbitrary"),
            vmem_limit_bytes=vmem_limit),
        cost_estimate=pl.CostEstimate(
            flops=int(flops), transcendentals=int(transcendentals),
            bytes_accessed=bytes_accessed),
    )(x,
      params["wqkv"], params["bqkv"], params["wo"], params["bo"],
      params["w1"], params["b1"], params["w2"], params["b2"],
      params["ln1_g"], params["ln1_b"], params["ln2_g"], params["ln2_b"],
      params["dec_w"], params["dec_b"])

    return jnp.transpose(out[:, :, :V], (1, 0, 2))         # (S, B, V)


# ----------------------------------------------------------------------------
# Params / positional encoding
# ----------------------------------------------------------------------------
def make_positional_encoding(max_len, embedding_dim):
    position = jnp.arange(0, max_len, dtype=jnp.float32)[:, None]
    div_term = jnp.exp(
        jnp.arange(0, embedding_dim, 2, dtype=jnp.float32)
        * (-math.log(10000.0) / embedding_dim)
    )
    pe = jnp.zeros((max_len, embedding_dim), dtype=jnp.float32)
    pe = pe.at[:, 0::2].set(jnp.sin(position * div_term))
    pe = pe.at[:, 1::2].set(jnp.cos(position * div_term))
    return pe[:, None, :]  # (max_len, 1, E)


def init_params(key, vocab_size, E, num_layers, hidden_dim, lane=128):
    L, F = num_layers, hidden_dim
    Vp = ((vocab_size + lane - 1) // lane) * lane           # lane-dense vocab pad
    k_emb, k_qkv, k_o, k_1, k_2, k_dec = jax.random.split(key, 6)
    initrange = 0.1
    s_e = 1.0 / math.sqrt(E)
    s_f = 1.0 / math.sqrt(F)

    def u(k, shape, s, dtype=jnp.float32):
        return jax.random.uniform(k, shape, jnp.float32, -s, s).astype(dtype)

    # Decoder weight pre-transposed to (E, V) then zero-padded to (E, Vp).
    dec_w = jnp.zeros((E, Vp), jnp.float32).at[:, :vocab_size].set(
        u(k_dec, (E, vocab_size), initrange))

    # Weights pre-transposed to (in, out), stacked over L; stored bf16 (MXU-native).
    return {
        "embedding": u(k_emb, (vocab_size, E), initrange),           # f32
        "wqkv": u(k_qkv, (L, E, 3 * E), s_e, jnp.bfloat16),          # fused Q/K/V
        "bqkv": jnp.zeros((L, 1, 3 * E), jnp.float32),
        "wo": u(k_o, (L, E, E), s_e, jnp.bfloat16),
        "bo": jnp.zeros((L, 1, E), jnp.float32),
        "w1": u(k_1, (L, E, F), s_e, jnp.bfloat16),
        "b1": jnp.zeros((L, 1, F), jnp.float32),
        "w2": u(k_2, (L, F, E), s_f, jnp.bfloat16),
        "b2": jnp.zeros((L, 1, E), jnp.float32),
        "ln1_g": jnp.ones((L, 1, E), jnp.float32),
        "ln1_b": jnp.zeros((L, 1, E), jnp.float32),
        "ln2_g": jnp.ones((L, 1, E), jnp.float32),
        "ln2_b": jnp.zeros((L, 1, E), jnp.float32),
        "dec_w": dec_w.astype(jnp.bfloat16),
        "dec_b": jnp.zeros((1, Vp), jnp.float32),
    }


# ----------------------------------------------------------------------------
# Main
# ----------------------------------------------------------------------------
if __name__ == "__main__":
    vocab_size = 16
    embedding_dim = 32
    num_layers = 2
    num_heads = 4
    hidden_dim = 64
    max_seq_length = 64
    seq_len = 8
    batch = 2

    key = jax.random.PRNGKey(0)
    pkey, skey = jax.random.split(key)

    params = init_params(pkey, vocab_size, embedding_dim, num_layers, hidden_dim)
    pe = make_positional_encoding(max_seq_length, embedding_dim)
    src = jax.random.randint(skey, (seq_len, batch), 0, vocab_size, dtype=jnp.int32)

    fwd = jax.jit(functools.partial(transformer_forward, num_heads=num_heads))
    out = fwd(src, params, pe)
    jax.block_until_ready(out)

    assert out.shape == (seq_len, batch, vocab_size)
    assert bool(jnp.all(jnp.isfinite(out)))
    print("KERNEL_OK")
</pallas_src>

<mosaic_0001>
module attributes {stable_mosaic.version = 11 : i64} {
  func.func @_transformer_kernel(%arg0: i32, %arg1: i32, %arg2: memref<1x8x32xf32, #tpu.memory_space<vmem>>, %arg3: memref<1x32x96xbf16, #tpu.memory_space<vmem>>, %arg4: memref<1x1x96xf32, #tpu.memory_space<vmem>>, %arg5: memref<1x32x32xbf16, #tpu.memory_space<vmem>>, %arg6: memref<1x1x32xf32, #tpu.memory_space<vmem>>, %arg7: memref<1x32x64xbf16, #tpu.memory_space<vmem>>, %arg8: memref<1x1x64xf32, #tpu.memory_space<vmem>>, %arg9: memref<1x64x32xbf16, #tpu.memory_space<vmem>>, %arg10: memref<1x1x32xf32, #tpu.memory_space<vmem>>, %arg11: memref<1x1x32xf32, #tpu.memory_space<vmem>>, %arg12: memref<1x1x32xf32, #tpu.memory_space<vmem>>, %arg13: memref<1x1x32xf32, #tpu.memory_space<vmem>>, %arg14: memref<1x1x32xf32, #tpu.memory_space<vmem>>, %arg15: memref<32x128xbf16, #tpu.memory_space<vmem>>, %arg16: memref<1x128xf32, #tpu.memory_space<vmem>>, %arg17: memref<1x8x128xf32, #tpu.memory_space<vmem>>, %arg18: memref<8x32xf32, #tpu.memory_space<vmem>>) attributes {dimension_semantics = [#tpu.dimension_semantics<parallel>, #tpu.dimension_semantics<arbitrary>], iteration_bounds = array<i64: 2, 2>, scalar_prefetch = 0 : i64, scratch_operands = 1 : i64, tpu.core_type = #tpu.core_type<tc>, window_params = [{transform_indices = @transform_0, window_bounds = array<i64: 1, 8, 32>}, {transform_indices = @transform_1, window_bounds = array<i64: 1, 32, 96>}, {transform_indices = @transform_2, window_bounds = array<i64: 1, 1, 96>}, {transform_indices = @transform_3, window_bounds = array<i64: 1, 32, 32>}, {transform_indices = @transform_4, window_bounds = array<i64: 1, 1, 32>}, {transform_indices = @transform_5, window_bounds = array<i64: 1, 32, 64>}, {transform_indices = @transform_6, window_bounds = array<i64: 1, 1, 64>}, {transform_indices = @transform_7, window_bounds = array<i64: 1, 64, 32>}, {transform_indices = @transform_8, window_bounds = array<i64: 1, 1, 32>}, {transform_indices = @transform_9, window_bounds = array<i64: 1, 1, 32>}, {transform_indices = @transform_10, window_bounds = array<i64: 1, 1, 32>}, {transform_indices = @transform_11, window_bounds = array<i64: 1, 1, 32>}, {transform_indices = @transform_12, window_bounds = array<i64: 1, 1, 32>}, {pipeline_mode = #tpu.pipeline_mode<synchronous>, transform_indices = @transform_13, window_bounds = array<i64: 32, 128>}, {pipeline_mode = #tpu.pipeline_mode<synchronous>, transform_indices = @transform_14, window_bounds = array<i64: 1, 128>}, {transform_indices = @transform_15, window_bounds = array<i64: 1, 8, 128>}]} {
    %c0_i32 = arith.constant 0 : i32
    %0 = arith.cmpi eq, %arg1, %c0_i32 : i32
    %1 = arith.extui %0 : i1 to i32
    %c0_i32_0 = arith.constant 0 : i32
    %2 = arith.cmpi ne, %1, %c0_i32_0 : i32
    scf.if %2 {
      %c0_85 = arith.constant 0 : index
      %c0_86 = arith.constant 0 : index
      %c0_87 = arith.constant 0 : index
      %193 = vector.load %arg2[%c0_85, %c0_86, %c0_87] : memref<1x8x32xf32, #tpu.memory_space<vmem>>, vector<1x8x32xf32>
      %194 = vector.shape_cast %193 : vector<1x8x32xf32> to vector<8x32xf32>
      %c0_88 = arith.constant 0 : index
      %c0_89 = arith.constant 0 : index
      %195 = vector.load %arg18[%c0_88, %c0_89] : memref<8x32xf32, #tpu.memory_space<vmem>>, vector<8x32xf32>
      tpu.vector_store %arg18[%c0_88, %c0_89], %194 {strides = array<i32>} : memref<8x32xf32, #tpu.memory_space<vmem>>, vector<8x32xf32>,
    } else {
    }
    %c0 = arith.constant 0 : index
    %c0_1 = arith.constant 0 : index
    %3 = vector.load %arg18[%c0, %c0_1] : memref<8x32xf32, #tpu.memory_space<vmem>>, vector<8x32xf32>
    %4 = arith.truncf %3 : vector<8x32xf32> to vector<8x32xbf16>
    %c0_2 = arith.constant 0 : index
    %c0_3 = arith.constant 0 : index
    %c0_4 = arith.constant 0 : index
    %5 = vector.load %arg3[%c0_2, %c0_3, %c0_4] : memref<1x32x96xbf16, #tpu.memory_space<vmem>>, vector<1x32x96xbf16>
    %6 = vector.shape_cast %5 : vector<1x32x96xbf16> to vector<32x96xbf16>
    %cst = arith.constant dense<0.000000e+00> : vector<8x96xf32>
    %7 = tpu.matmul %4, %6, %cst {dimension_numbers = #tpu.dot_dimension_numbers<[1], [0], [0], [1], [0, 0, 1, 1], [], []>} : vector<8x32xbf16>, vector<32x96xbf16>, vector<8x96xf32> -> vector<8x96xf32>
    %c0_5 = arith.constant 0 : index
    %c0_6 = arith.constant 0 : index
    %c0_7 = arith.constant 0 : index
    %8 = vector.load %arg4[%c0_5, %c0_6, %c0_7] : memref<1x1x96xf32, #tpu.memory_space<vmem>>, vector<1x1x96xf32>
    %9 = vector.shape_cast %8 : vector<1x1x96xf32> to vector<1x96xf32>
    %10 = vector.broadcast %9 : vector<1x96xf32> to vector<8x96xf32>
    %11 = arith.addf %7, %10 : vector<8x96xf32>
    %cst_8 = arith.constant 0.000000e+00 : f32
    %12 = vector.broadcast %cst_8 : f32 to vector<8x32xf32>
    %13 = vector.extract_strided_slice %11 {offsets = [0, 0], sizes = [8, 8], strides = [1, 1]} : vector<8x96xf32> to vector<8x8xf32>
    %14 = arith.truncf %13 : vector<8x8xf32> to vector<8x8xbf16>
    %15 = vector.extract_strided_slice %11 {offsets = [0, 32], sizes = [8, 8], strides = [1, 1]} : vector<8x96xf32> to vector<8x8xf32>
    %16 = arith.truncf %15 : vector<8x8xf32> to vector<8x8xbf16>
    %17 = vector.extract_strided_slice %11 {offsets = [0, 64], sizes = [8, 8], strides = [1, 1]} : vector<8x96xf32> to vector<8x8xf32>
    %18 = arith.truncf %17 : vector<8x8xf32> to vector<8x8xbf16>
    %cst_9 = arith.constant dense<0.000000e+00> : vector<8x8xf32>
    %19 = tpu.matmul %14, %16, %cst_9 {dimension_numbers = #tpu.dot_dimension_numbers<[1], [1], [0], [0], [0, 0, 1, 0], [], []>} : vector<8x8xbf16>, vector<8x8xbf16>, vector<8x8xf32> -> vector<8x8xf32>
    %cst_10 = arith.constant 0.353553385 : f32
    %20 = vector.broadcast %cst_10 : f32 to vector<8x8xf32>
    %21 = arith.mulf %19, %20 : vector<8x8xf32>
    %cst_11 = arith.constant dense<0xFF800000> : vector<8xf32>
    %22 = vector.multi_reduction <maximumf>, %21, %cst_11 [1] : vector<8x8xf32> to vector<8xf32>
    %23 = vector.shape_cast %22 : vector<8xf32> to vector<8x1xf32>
    %24 = vector.broadcast %23 : vector<8x1xf32> to vector<8x8xf32>
    %25 = arith.subf %21, %24 : vector<8x8xf32>
    %26 = math.exp %25 : vector<8x8xf32>
    %cst_12 = arith.constant dense<0.000000e+00> : vector<8xf32>
    %27 = vector.multi_reduction <add>, %26, %cst_12 [1] : vector<8x8xf32> to vector<8xf32>
    %28 = vector.shape_cast %27 : vector<8xf32> to vector<8x1xf32>
    %29 = vector.broadcast %28 : vector<8x1xf32> to vector<8x8xf32>
    %30 = arith.divf %26, %29 : vector<8x8xf32>
    %31 = arith.truncf %30 : vector<8x8xf32> to vector<8x8xbf16>
    %cst_13 = arith.constant dense<0.000000e+00> : vector<8x8xf32>
    %32 = tpu.matmul %31, %18, %cst_13 {dimension_numbers = #tpu.dot_dimension_numbers<[1], [0], [0], [1], [0, 0, 1, 1], [], []>} : vector<8x8xbf16>, vector<8x8xbf16>, vector<8x8xf32> -> vector<8x8xf32>
    %33 = arith.truncf %32 : vector<8x8xf32> to vector<8x8xbf16>
    %c0_14 = arith.constant 0 : index
    %c0_15 = arith.constant 0 : index
    %c0_16 = arith.constant 0 : index
    %34 = vector.load %arg5[%c0_14, %c0_15, %c0_16] : memref<1x32x32xbf16, #tpu.memory_space<vmem>>, vector<1x8x32xbf16>
    %35 = vector.shape_cast %34 : vector<1x8x32xbf16> to vector<8x32xbf16>
    %cst_17 = arith.constant dense<0.000000e+00> : vector<8x32xf32>
    %36 = tpu.matmul %33, %35, %cst_17 {dimension_numbers = #tpu.dot_dimension_numbers<[1], [0], [0], [1], [0, 0, 1, 1], [], []>} : vector<8x8xbf16>, vector<8x32xbf16>, vector<8x32xf32> -> vector<8x32xf32>
    %37 = arith.addf %12, %36 : vector<8x32xf32>
    %38 = vector.extract_strided_slice %11 {offsets = [0, 8], sizes = [8, 8], strides = [1, 1]} : vector<8x96xf32> to vector<8x8xf32>
    %39 = arith.truncf %38 : vector<8x8xf32> to vector<8x8xbf16>
    %40 = vector.extract_strided_slice %11 {offsets = [0, 40], sizes = [8, 8], strides = [1, 1]} : vector<8x96xf32> to vector<8x8xf32>
    %41 = arith.truncf %40 : vector<8x8xf32> to vector<8x8xbf16>
    %42 = vector.extract_strided_slice %11 {offsets = [0, 72], sizes = [8, 8], strides = [1, 1]} : vector<8x96xf32> to vector<8x8xf32>
    %43 = arith.truncf %42 : vector<8x8xf32> to vector<8x8xbf16>
    %cst_18 = arith.constant dense<0.000000e+00> : vector<8x8xf32>
    %44 = tpu.matmul %39, %41, %cst_18 {dimension_numbers = #tpu.dot_dimension_numbers<[1], [1], [0], [0], [0, 0, 1, 0], [], []>} : vector<8x8xbf16>, vector<8x8xbf16>, vector<8x8xf32> -> vector<8x8xf32>
    %cst_19 = arith.constant 0.353553385 : f32
    %45 = vector.broadcast %cst_19 : f32 to vector<8x8xf32>
    %46 = arith.mulf %44, %45 : vector<8x8xf32>
    %cst_20 = arith.constant dense<0xFF800000> : vector<8xf32>
    %47 = vector.multi_reduction <maximumf>, %46, %cst_20 [1] : vector<8x8xf32> to vector<8xf32>
    %48 = vector.shape_cast %47 : vector<8xf32> to vector<8x1xf32>
    %49 = vector.broadcast %48 : vector<8x1xf32> to vector<8x8xf32>
    %50 = arith.subf %46, %49 : vector<8x8xf32>
    %51 = math.exp %50 : vector<8x8xf32>
    %cst_21 = arith.constant dense<0.000000e+00> : vector<8xf32>
    %52 = vector.multi_reduction <add>, %51, %cst_21 [1] : vector<8x8xf32> to vector<8xf32>
    %53 = vector.shape_cast %52 : vector<8xf32> to vector<8x1xf32>
    %54 = vector.broadcast %53 : vector<8x1xf32> to vector<8x8xf32>
    %55 = arith.divf %51, %54 : vector<8x8xf32>
    %56 = arith.truncf %55 : vector<8x8xf32> to vector<8x8xbf16>
    %cst_22 = arith.constant dense<0.000000e+00> : vector<8x8xf32>
    %57 = tpu.matmul %56, %43, %cst_22 {dimension_numbers = #tpu.dot_dimension_numbers<[1], [0], [0], [1], [0, 0, 1, 1], [], []>} : vector<8x8xbf16>, vector<8x8xbf16>, vector<8x8xf32> -> vector<8x8xf32>
    %58 = arith.truncf %57 : vector<8x8xf32> to vector<8x8xbf16>
    %c0_23 = arith.constant 0 : index
    %c8 = arith.constant 8 : index
    %c0_24 = arith.constant 0 : index
    %59 = vector.load %arg5[%c0_23, %c8, %c0_24] : memref<1x32x32xbf16, #tpu.memory_space<vmem>>, vector<1x8x32xbf16>
    %60 = vector.shape_cast %59 : vector<1x8x32xbf16> to vector<8x32xbf16>
    %cst_25 = arith.constant dense<0.000000e+00> : vector<8x32xf32>
    %61 = tpu.matmul %58, %60, %cst_25 {dimension_numbers = #tpu.dot_dimension_numbers<[1], [0], [0], [1], [0, 0, 1, 1], [], []>} : vector<8x8xbf16>, vector<8x32xbf16>, vector<8x32xf32> -> vector<8x32xf32>
    %62 = arith.addf %37, %61 : vector<8x32xf32>
    %63 = vector.extract_strided_slice %11 {offsets = [0, 16], sizes = [8, 8], strides = [1, 1]} : vector<8x96xf32> to vector<8x8xf32>
    %64 = arith.truncf %63 : vector<8x8xf32> to vector<8x8xbf16>
    %65 = vector.extract_strided_slice %11 {offsets = [0, 48], sizes = [8, 8], strides = [1, 1]} : vector<8x96xf32> to vector<8x8xf32>
    %66 = arith.truncf %65 : vector<8x8xf32> to vector<8x8xbf16>
    %67 = vector.extract_strided_slice %11 {offsets = [0, 80], sizes = [8, 8], strides = [1, 1]} : vector<8x96xf32> to vector<8x8xf32>
    %68 = arith.truncf %67 : vector<8x8xf32> to vector<8x8xbf16>
    %cst_26 = arith.constant dense<0.000000e+00> : vector<8x8xf32>
    %69 = tpu.matmul %64, %66, %cst_26 {dimension_numbers = #tpu.dot_dimension_numbers<[1], [1], [0], [0], [0, 0, 1, 0], [], []>} : vector<8x8xbf16>, vector<8x8xbf16>, vector<8x8xf32> -> vector<8x8xf32>
    %cst_27 = arith.constant 0.353553385 : f32
    %70 = vector.broadcast %cst_27 : f32 to vector<8x8xf32>
    %71 = arith.mulf %69, %70 : vector<8x8xf32>
    %cst_28 = arith.constant dense<0xFF800000> : vector<8xf32>
    %72 = vector.multi_reduction <maximumf>, %71, %cst_28 [1] : vector<8x8xf32> to vector<8xf32>
    %73 = vector.shape_cast %72 : vector<8xf32> to vector<8x1xf32>
    %74 = vector.broadcast %73 : vector<8x1xf32> to vector<8x8xf32>
    %75 = arith.subf %71, %74 : vector<8x8xf32>
    %76 = math.exp %75 : vector<8x8xf32>
    %cst_29 = arith.constant dense<0.000000e+00> : vector<8xf32>
    %77 = vector.multi_reduction <add>, %76, %cst_29 [1] : vector<8x8xf32> to vector<8xf32>
    %78 = vector.shape_cast %77 : vector<8xf32> to vector<8x1xf32>
    %79 = vector.broadcast %78 : vector<8x1xf32> to vector<8x8xf32>
    %80 = arith.divf %76, %79 : vector<8x8xf32>
    %81 = arith.truncf %80 : vector<8x8xf32> to vector<8x8xbf16>
    %cst_30 = arith.constant dense<0.000000e+00> : vector<8x8xf32>
    %82 = tpu.matmul %81, %68, %cst_30 {dimension_numbers = #tpu.dot_dimension_numbers<[1], [0], [0], [1], [0, 0, 1, 1], [], []>} : vector<8x8xbf16>, vector<8x8xbf16>, vector<8x8xf32> -> vector<8x8xf32>
    %83 = arith.truncf %82 : vector<8x8xf32> to vector<8x8xbf16>
    %c0_31 = arith.constant 0 : index
    %c16 = arith.constant 16 : index
    %c0_32 = arith.constant 0 : index
    %84 = vector.load %arg5[%c0_31, %c16, %c0_32] : memref<1x32x32xbf16, #tpu.memory_space<vmem>>, vector<1x8x32xbf16>
    %85 = vector.shape_cast %84 : vector<1x8x32xbf16> to vector<8x32xbf16>
    %cst_33 = arith.constant dense<0.000000e+00> : vector<8x32xf32>
    %86 = tpu.matmul %83, %85, %cst_33 {dimension_numbers = #tpu.dot_dimension_numbers<[1], [0], [0], [1], [0, 0, 1, 1], [], []>} : vector<8x8xbf16>, vector<8x32xbf16>, vector<8x32xf32> -> vector<8x32xf32>
    %87 = arith.addf %62, %86 : vector<8x32xf32>
    %88 = vector.extract_strided_slice %11 {offsets = [0, 24], sizes = [8, 8], strides = [1, 1]} : vector<8x96xf32> to vector<8x8xf32>
    %89 = arith.truncf %88 : vector<8x8xf32> to vector<8x8xbf16>
    %90 = vector.extract_strided_slice %11 {offsets = [0, 56], sizes = [8, 8], strides = [1, 1]} : vector<8x96xf32> to vector<8x8xf32>
    %91 = arith.truncf %90 : vector<8x8xf32> to vector<8x8xbf16>
    %92 = vector.extract_strided_slice %11 {offsets = [0, 88], sizes = [8, 8], strides = [1, 1]} : vector<8x96xf32> to vector<8x8xf32>
    %93 = arith.truncf %92 : vector<8x8xf32> to vector<8x8xbf16>
    %cst_34 = arith.constant dense<0.000000e+00> : vector<8x8xf32>
    %94 = tpu.matmul %89, %91, %cst_34 {dimension_numbers = #tpu.dot_dimension_numbers<[1], [1], [0], [0], [0, 0, 1, 0], [], []>} : vector<8x8xbf16>, vector<8x8xbf16>, vector<8x8xf32> -> vector<8x8xf32>
    %cst_35 = arith.constant 0.353553385 : f32
    %95 = vector.broadcast %cst_35 : f32 to vector<8x8xf32>
    %96 = arith.mulf %94, %95 : vector<8x8xf32>
    %cst_36 = arith.constant dense<0xFF800000> : vector<8xf32>
    %97 = vector.multi_reduction <maximumf>, %96, %cst_36 [1] : vector<8x8xf32> to vector<8xf32>
    %98 = vector.shape_cast %97 : vector<8xf32> to vector<8x1xf32>
    %99 = vector.broadcast %98 : vector<8x1xf32> to vector<8x8xf32>
    %100 = arith.subf %96, %99 : vector<8x8xf32>
    %101 = math.exp %100 : vector<8x8xf32>
    %cst_37 = arith.constant dense<0.000000e+00> : vector<8xf32>
    %102 = vector.multi_reduction <add>, %101, %cst_37 [1] : vector<8x8xf32> to vector<8xf32>
    %103 = vector.shape_cast %102 : vector<8xf32> to vector<8x1xf32>
    %104 = vector.broadcast %103 : vector<8x1xf32> to vector<8x8xf32>
    %105 = arith.divf %101, %104 : vector<8x8xf32>
    %106 = arith.truncf %105 : vector<8x8xf32> to vector<8x8xbf16>
    %cst_38 = arith.constant dense<0.000000e+00> : vector<8x8xf32>
    %107 = tpu.matmul %106, %93, %cst_38 {dimension_numbers = #tpu.dot_dimension_numbers<[1], [0], [0], [1], [0, 0, 1, 1], [], []>} : vector<8x8xbf16>, vector<8x8xbf16>, vector<8x8xf32> -> vector<8x8xf32>
    %108 = arith.truncf %107 : vector<8x8xf32> to vector<8x8xbf16>
    %c0_39 = arith.constant 0 : index
    %c24 = arith.constant 24 : index
    %c0_40 = arith.constant 0 : index
    %109 = vector.load %arg5[%c0_39, %c24, %c0_40] : memref<1x32x32xbf16, #tpu.memory_space<vmem>>, vector<1x8x32xbf16>
    %110 = vector.shape_cast %109 : vector<1x8x32xbf16> to vector<8x32xbf16>
    %cst_41 = arith.constant dense<0.000000e+00> : vector<8x32xf32>
    %111 = tpu.matmul %108, %110, %cst_41 {dimension_numbers = #tpu.dot_dimension_numbers<[1], [0], [0], [1], [0, 0, 1, 1], [], []>} : vector<8x8xbf16>, vector<8x32xbf16>, vector<8x32xf32> -> vector<8x32xf32>
    %112 = arith.addf %87, %111 : vector<8x32xf32>
    %c0_42 = arith.constant 0 : index
    %c0_43 = arith.constant 0 : index
    %c0_44 = arith.constant 0 : index
    %113 = vector.load %arg6[%c0_42, %c0_43, %c0_44] : memref<1x1x32xf32, #tpu.memory_space<vmem>>, vector<1x1x32xf32>
    %114 = vector.shape_cast %113 : vector<1x1x32xf32> to vector<1x32xf32>
    %115 = vector.broadcast %114 : vector<1x32xf32> to vector<8x32xf32>
    %116 = arith.addf %112, %115 : vector<8x32xf32>
    %117 = arith.addf %3, %116 : vector<8x32xf32>
    %c0_45 = arith.constant 0 : index
    %c0_46 = arith.constant 0 : index
    %c0_47 = arith.constant 0 : index
    %118 = vector.load %arg11[%c0_45, %c0_46, %c0_47] : memref<1x1x32xf32, #tpu.memory_space<vmem>>, vector<1x1x32xf32>
    %119 = vector.shape_cast %118 : vector<1x1x32xf32> to vector<1x32xf32>
    %c0_48 = arith.constant 0 : index
    %c0_49 = arith.constant 0 : index
    %c0_50 = arith.constant 0 : index
    %120 = vector.load %arg12[%c0_48, %c0_49, %c0_50] : memref<1x1x32xf32, #tpu.memory_space<vmem>>, vector<1x1x32xf32>
    %121 = vector.shape_cast %120 : vector<1x1x32xf32> to vector<1x32xf32>
    %cst_51 = arith.constant dense<0.000000e+00> : vector<8xf32>
    %122 = vector.multi_reduction <add>, %117, %cst_51 [1] : vector<8x32xf32> to vector<8xf32>
    %123 = vector.shape_cast %122 : vector<8xf32> to vector<8x1xf32>
    %cst_52 = arith.constant 3.200000e+01 : f32
    %124 = vector.broadcast %cst_52 : f32 to vector<8x1xf32>
    %125 = arith.divf %123, %124 : vector<8x1xf32>
    %126 = vector.broadcast %125 : vector<8x1xf32> to vector<8x32xf32>
    %127 = arith.subf %117, %126 : vector<8x32xf32>
    %128 = arith.mulf %127, %127 : vector<8x32xf32>
    %cst_53 = arith.constant dense<0.000000e+00> : vector<8xf32>
    %129 = vector.multi_reduction <add>, %128, %cst_53 [1] : vector<8x32xf32> to vector<8xf32>
    %130 = vector.shape_cast %129 : vector<8xf32> to vector<8x1xf32>
    %cst_54 = arith.constant 3.200000e+01 : f32
    %131 = vector.broadcast %cst_54 : f32 to vector<8x1xf32>
    %132 = arith.divf %130, %131 : vector<8x1xf32>
    %133 = vector.broadcast %125 : vector<8x1xf32> to vector<8x32xf32>
    %134 = arith.subf %117, %133 : vector<8x32xf32>
    %cst_55 = arith.constant 9.99999974E-6 : f32
    %135 = vector.broadcast %cst_55 : f32 to vector<8x1xf32>
    %136 = arith.addf %132, %135 : vector<8x1xf32>
    %137 = math.rsqrt %136 : vector<8x1xf32>
    %138 = vector.broadcast %137 : vector<8x1xf32> to vector<8x32xf32>
    %139 = arith.mulf %134, %138 : vector<8x32xf32>
    %140 = vector.broadcast %119 : vector<1x32xf32> to vector<8x32xf32>
    %141 = arith.mulf %139, %140 : vector<8x32xf32>
    %142 = vector.broadcast %121 : vector<1x32xf32> to vector<8x32xf32>
    %143 = arith.addf %141, %142 : vector<8x32xf32>
    %144 = arith.truncf %143 : vector<8x32xf32> to vector<8x32xbf16>
    %c0_56 = arith.constant 0 : index
    %c0_57 = arith.constant 0 : index
    %c0_58 = arith.constant 0 : index
    %145 = vector.load %arg7[%c0_56, %c0_57, %c0_58] : memref<1x32x64xbf16, #tpu.memory_space<vmem>>, vector<1x32x64xbf16>
    %146 = vector.shape_cast %145 : vector<1x32x64xbf16> to vector<32x64xbf16>
    %cst_59 = arith.constant dense<0.000000e+00> : vector<8x64xf32>
    %147 = tpu.matmul %144, %146, %cst_59 {dimension_numbers = #tpu.dot_dimension_numbers<[1], [0], [0], [1], [0, 0, 1, 1], [], []>} : vector<8x32xbf16>, vector<32x64xbf16>, vector<8x64xf32> -> vector<8x64xf32>
    %c0_60 = arith.constant 0 : index
    %c0_61 = arith.constant 0 : index
    %c0_62 = arith.constant 0 : index
    %148 = vector.load %arg8[%c0_60, %c0_61, %c0_62] : memref<1x1x64xf32, #tpu.memory_space<vmem>>, vector<1x1x64xf32>
    %149 = vector.shape_cast %148 : vector<1x1x64xf32> to vector<1x64xf32>
    %150 = vector.broadcast %149 : vector<1x64xf32> to vector<8x64xf32>
    %151 = arith.addf %147, %150 : vector<8x64xf32>
    %cst_63 = arith.constant 0.000000e+00 : f32
    %152 = vector.broadcast %cst_63 : f32 to vector<8x64xf32>
    %153 = arith.maximumf %151, %152 : vector<8x64xf32>
    %154 = arith.truncf %153 : vector<8x64xf32> to vector<8x64xbf16>
    %c0_64 = arith.constant 0 : index
    %c0_65 = arith.constant 0 : index
    %c0_66 = arith.constant 0 : index
    %155 = vector.load %arg9[%c0_64, %c0_65, %c0_66] : memref<1x64x32xbf16, #tpu.memory_space<vmem>>, vector<1x64x32xbf16>
    %156 = vector.shape_cast %155 : vector<1x64x32xbf16> to vector<64x32xbf16>
    %cst_67 = arith.constant dense<0.000000e+00> : vector<8x32xf32>
    %157 = tpu.matmul %154, %156, %cst_67 {dimension_numbers = #tpu.dot_dimension_numbers<[1], [0], [0], [1], [0, 0, 1, 1], [], []>} : vector<8x64xbf16>, vector<64x32xbf16>, vector<8x32xf32> -> vector<8x32xf32>
    %c0_68 = arith.constant 0 : index
    %c0_69 = arith.constant 0 : index
    %c0_70 = arith.constant 0 : index
    %158 = vector.load %arg10[%c0_68, %c0_69, %c0_70] : memref<1x1x32xf32, #tpu.memory_space<vmem>>, vector<1x1x32xf32>
    %159 = vector.shape_cast %158 : vector<1x1x32xf32> to vector<1x32xf32>
    %160 = vector.broadcast %159 : vector<1x32xf32> to vector<8x32xf32>
    %161 = arith.addf %157, %160 : vector<8x32xf32>
    %162 = arith.addf %143, %161 : vector<8x32xf32>
    %c0_71 = arith.constant 0 : index
    %c0_72 = arith.constant 0 : index
    %c0_73 = arith.constant 0 : index
    %163 = vector.load %arg13[%c0_71, %c0_72, %c0_73] : memref<1x1x32xf32, #tpu.memory_space<vmem>>, vector<1x1x32xf32>
    %164 = vector.shape_cast %163 : vector<1x1x32xf32> to vector<1x32xf32>
    %c0_74 = arith.constant 0 : index
    %c0_75 = arith.constant 0 : index
    %c0_76 = arith.constant 0 : index
    %165 = vector.load %arg14[%c0_74, %c0_75, %c0_76] : memref<1x1x32xf32, #tpu.memory_space<vmem>>, vector<1x1x32xf32>
    %166 = vector.shape_cast %165 : vector<1x1x32xf32> to vector<1x32xf32>
    %cst_77 = arith.constant dense<0.000000e+00> : vector<8xf32>
    %167 = vector.multi_reduction <add>, %162, %cst_77 [1] : vector<8x32xf32> to vector<8xf32>
    %168 = vector.shape_cast %167 : vector<8xf32> to vector<8x1xf32>
    %cst_78 = arith.constant 3.200000e+01 : f32
    %169 = vector.broadcast %cst_78 : f32 to vector<8x1xf32>
    %170 = arith.divf %168, %169 : vector<8x1xf32>
    %171 = vector.broadcast %170 : vector<8x1xf32> to vector<8x32xf32>
    %172 = arith.subf %162, %171 : vector<8x32xf32>
    %173 = arith.mulf %172, %172 : vector<8x32xf32>
    %cst_79 = arith.constant dense<0.000000e+00> : vector<8xf32>
    %174 = vector.multi_reduction <add>, %173, %cst_79 [1] : vector<8x32xf32> to vector<8xf32>
    %175 = vector.shape_cast %174 : vector<8xf32> to vector<8x1xf32>
    %cst_80 = arith.constant 3.200000e+01 : f32
    %176 = vector.broadcast %cst_80 : f32 to vector<8x1xf32>
    %177 = arith.divf %175, %176 : vector<8x1xf32>
    %178 = vector.broadcast %170 : vector<8x1xf32> to vector<8x32xf32>
    %179 = arith.subf %162, %178 : vector<8x32xf32>
    %cst_81 = arith.constant 9.99999974E-6 : f32
    %180 = vector.broadcast %cst_81 : f32 to vector<8x1xf32>
    %181 = arith.addf %177, %180 : vector<8x1xf32>
    %182 = math.rsqrt %181 : vector<8x1xf32>
    %183 = vector.broadcast %182 : vector<8x1xf32> to vector<8x32xf32>
    %184 = arith.mulf %179, %183 : vector<8x32xf32>
    %185 = vector.broadcast %164 : vector<1x32xf32> to vector<8x32xf32>
    %186 = arith.mulf %184, %185 : vector<8x32xf32>
    %187 = vector.broadcast %166 : vector<1x32xf32> to vector<8x32xf32>
    %188 = arith.addf %186, %187 : vector<8x32xf32>
    %c0_82 = arith.constant 0 : index
    %c0_83 = arith.constant 0 : index
    %189 = vector.load %arg18[%c0_82, %c0_83] : memref<8x32xf32, #tpu.memory_space<vmem>>, vector<8x32xf32>
    tpu.vector_store %arg18[%c0_82, %c0_83], %188 {strides = array<i32>} : memref<8x32xf32, #tpu.memory_space<vmem>>, vector<8x32xf32>,
    %c1_i32 = arith.constant 1 : i32
    %190 = arith.cmpi eq, %arg1, %c1_i32 : i32
    %191 = arith.extui %190 : i1 to i32
    %c0_i32_84 = arith.constant 0 : i32
    %192 = arith.cmpi ne, %191, %c0_i32_84 : i32
    scf.if %192 {
      %193 = arith.truncf %188 : vector<8x32xf32> to vector<8x32xbf16>
      %c0_85 = arith.constant 0 : index
      %c0_86 = arith.constant 0 : index
      %194 = vector.load %arg15[%c0_85, %c0_86] : memref<32x128xbf16, #tpu.memory_space<vmem>>, vector<32x128xbf16>
      %cst_87 = arith.constant dense<0.000000e+00> : vector<8x128xf32>
      %195 = tpu.matmul %193, %194, %cst_87 {dimension_numbers = #tpu.dot_dimension_numbers<[1], [0], [0], [1], [0, 0, 1, 1], [], []>} : vector<8x32xbf16>, vector<32x128xbf16>, vector<8x128xf32> -> vector<8x128xf32>
      %c0_88 = arith.constant 0 : index
      %c0_89 = arith.constant 0 : index
      %196 = vector.load %arg16[%c0_88, %c0_89] : memref<1x128xf32, #tpu.memory_space<vmem>>, vector<1x128xf32>
      %197 = vector.broadcast %196 : vector<1x128xf32> to vector<8x128xf32>
      %198 = arith.addf %195, %197 : vector<8x128xf32>
      %c0_90 = arith.constant 0 : index
      %c0_91 = arith.constant 0 : index
      %c0_92 = arith.constant 0 : index
      %199 = vector.load %arg17[%c0_90, %c0_91, %c0_92] : memref<1x8x128xf32, #tpu.memory_space<vmem>>, vector<1x8x128xf32>
      %200 = vector.shape_cast %199 : vector<1x8x128xf32> to vector<8x128xf32>
      %201 = vector.shape_cast %198 : vector<8x128xf32> to vector<1x8x128xf32>
      tpu.vector_store %arg17[%c0_90, %c0_91, %c0_92], %201 {strides = array<i32>} : memref<1x8x128xf32, #tpu.memory_space<vmem>>, vector<1x8x128xf32>,
    } else {
    }
    return
  }
  func.func @transform_0(%arg0: i32, %arg1: i32) -> (i32, i32, i32) {
    %c0_i32 = arith.constant 0 : i32
    %c0_i32_0 = arith.constant 0 : i32
    %c0_i32_1 = arith.constant 0 : i32
    return %arg0, %c0_i32, %c0_i32_0 : i32, i32, i32
  }
  func.func @transform_1(%arg0: i32, %arg1: i32) -> (i32, i32, i32) {
    %c0_i32 = arith.constant 0 : i32
    %c0_i32_0 = arith.constant 0 : i32
    %c0_i32_1 = arith.constant 0 : i32
    return %arg1, %c0_i32, %c0_i32_0 : i32, i32, i32
  }
  func.func @transform_2(%arg0: i32, %arg1: i32) -> (i32, i32, i32) {
    %c0_i32 = arith.constant 0 : i32
    %c0_i32_0 = arith.constant 0 : i32
    %c0_i32_1 = arith.constant 0 : i32
    return %arg1, %c0_i32, %c0_i32_0 : i32, i32, i32
  }
  func.func @transform_3(%arg0: i32, %arg1: i32) -> (i32, i32, i32) {
    %c0_i32 = arith.constant 0 : i32
    %c0_i32_0 = arith.constant 0 : i32
    %c0_i32_1 = arith.constant 0 : i32
    return %arg1, %c0_i32, %c0_i32_0 : i32, i32, i32
  }
  func.func @transform_4(%arg0: i32, %arg1: i32) -> (i32, i32, i32) {
    %c0_i32 = arith.constant 0 : i32
    %c0_i32_0 = arith.constant 0 : i32
    %c0_i32_1 = arith.constant 0 : i32
    return %arg1, %c0_i32, %c0_i32_0 : i32, i32, i32
  }
  func.func @transform_5(%arg0: i32, %arg1: i32) -> (i32, i32, i32) {
    %c0_i32 = arith.constant 0 : i32
    %c0_i32_0 = arith.constant 0 : i32
    %c0_i32_1 = arith.constant 0 : i32
    return %arg1, %c0_i32, %c0_i32_0 : i32, i32, i32
  }
  func.func @transform_6(%arg0: i32, %arg1: i32) -> (i32, i32, i32) {
    %c0_i32 = arith.constant 0 : i32
    %c0_i32_0 = arith.constant 0 : i32
    %c0_i32_1 = arith.constant 0 : i32
    return %arg1, %c0_i32, %c0_i32_0 : i32, i32, i32
  }
  func.func @transform_7(%arg0: i32, %arg1: i32) -> (i32, i32, i32) {
    %c0_i32 = arith.constant 0 : i32
    %c0_i32_0 = arith.constant 0 : i32
    %c0_i32_1 = arith.constant 0 : i32
    return %arg1, %c0_i32, %c0_i32_0 : i32, i32, i32
  }
  func.func @transform_8(%arg0: i32, %arg1: i32) -> (i32, i32, i32) {
    %c0_i32 = arith.constant 0 : i32
    %c0_i32_0 = arith.constant 0 : i32
    %c0_i32_1 = arith.constant 0 : i32
    return %arg1, %c0_i32, %c0_i32_0 : i32, i32, i32
  }
  func.func @transform_9(%arg0: i32, %arg1: i32) -> (i32, i32, i32) {
    %c0_i32 = arith.constant 0 : i32
    %c0_i32_0 = arith.constant 0 : i32
    %c0_i32_1 = arith.constant 0 : i32
    return %arg1, %c0_i32, %c0_i32_0 : i32, i32, i32
  }
  func.func @transform_10(%arg0: i32, %arg1: i32) -> (i32, i32, i32) {
    %c0_i32 = arith.constant 0 : i32
    %c0_i32_0 = arith.constant 0 : i32
    %c0_i32_1 = arith.constant 0 : i32
    return %arg1, %c0_i32, %c0_i32_0 : i32, i32, i32
  }
  func.func @transform_11(%arg0: i32, %arg1: i32) -> (i32, i32, i32) {
    %c0_i32 = arith.constant 0 : i32
    %c0_i32_0 = arith.constant 0 : i32
    %c0_i32_1 = arith.constant 0 : i32
    return %arg1, %c0_i32, %c0_i32_0 : i32, i32, i32
  }
  func.func @transform_12(%arg0: i32, %arg1: i32) -> (i32, i32, i32) {
    %c0_i32 = arith.constant 0 : i32
    %c0_i32_0 = arith.constant 0 : i32
    %c0_i32_1 = arith.constant 0 : i32
    return %arg1, %c0_i32, %c0_i32_0 : i32, i32, i32
  }
  func.func @transform_13(%arg0: i32, %arg1: i32) -> (i32, i32) {
    %c0_i32 = arith.constant 0 : i32
    %c0_i32_0 = arith.constant 0 : i32
    %c0_i32_1 = arith.constant 0 : i32
    return %c0_i32, %c0_i32_0 : i32, i32
  }
  func.func @transform_14(%arg0: i32, %arg1: i32) -> (i32, i32) {
    %c0_i32 = arith.constant 0 : i32
    %c0_i32_0 = arith.constant 0 : i32
    %c0_i32_1 = arith.constant 0 : i32
    return %c0_i32, %c0_i32_0 : i32, i32
  }
  func.func @transform_15(%arg0: i32, %arg1: i32) -> (i32, i32, i32) {
    %c0_i32 = arith.constant 0 : i32
    %c0_i32_0 = arith.constant 0 : i32
    %c0_i32_1 = arith.constant 0 : i32
    return %arg0, %c0_i32, %c0_i32_0 : i32, i32, i32
  }
}

</mosaic_0001>

<bundles_post_ra>
// kernel: transformer_forward.1
= control target key start
LH: loop header
LB: loop body
LE: loop exit
PB: predicated region body
PF: predicated region fallthrough
CT: control target
= control target key end

     0   :  { %s2313_s18 = smov 0   ;;  %s2315_s19 = smov 0   ;;  %s2598_s0 = inlined_call_operand.vmem [shape: f32[2,8,32], index: 0, kind: input, shape index: {}]   ;;  %s2599_s1 = inlined_call_operand.vmem [shape: bf16[2,32,96], index: 1, kind: input, shape index: {}]   ;;  %s2600_s2 = inlined_call_operand.vmem [shape: f32[2,1,96], index: 2, kind: input, shape index: {}]   ;;  %s2601_s3 = inlined_call_operand.vmem [shape: bf16[2,32,32], index: 3, kind: input, shape index: {}]   ;;  %s2602_s4 = inlined_call_operand.vmem [shape: f32[2,1,32], index: 4, kind: input, shape index: {}]   ;;  %s2603_s5 = inlined_call_operand.vmem [shape: bf16[2,32,64], index: 5, kind: input, shape index: {}]   ;;  %s2604_s6 = inlined_call_operand.vmem [shape: f32[2,1,64], index: 6, kind: input, shape index: {}]   ;;  %s2605_s7 = inlined_call_operand.vmem [shape: bf16[2,64,32], index: 7, kind: input, shape index: {}]   ;;  %s2606_s8 = inlined_call_operand.vmem [shape: f32[2,1,32], index: 8, kind: input, shape index: {}]   ;;  %s2607_s9 = inlined_call_operand.vmem [shape: f32[2,1,32], index: 9, kind: input, shape index: {}]   ;;  %s2608_s10 = inlined_call_operand.vmem [shape: f32[2,1,32], index: 10, kind: input, shape index: {}]   ;;  %s2609_s11 = inlined_call_operand.vmem [shape: f32[2,1,32], index: 11, kind: input, shape index: {}]   ;;  %s2610_s12 = inlined_call_operand.vmem [shape: f32[2,1,32], index: 12, kind: input, shape index: {}]   ;;  %s2611_s13 = inlined_call_operand.vmem [shape: bf16[32,128], index: 13, kind: input, shape index: {}]   ;;  %s2612_s14 = inlined_call_operand.vmem [shape: f32[1,128], index: 14, kind: input, shape index: {}]   ;;  %s2613_s15 = inlined_call_operand.vmem [shape: f32[2,8,128], index: 15, kind: output, shape index: {}]  }
   0x1   :  { %2620 = sst [smem:[#allocation10_spill]] %s2598_s0  ;;  %s2317_s20 = smov 0  }
   0x2   :  { %2621 = sst [smem:[#allocation11_spill]] %s2599_s1  ;;  %s2319_s21 = smov 0  }
   0x3   :  { %2622 = sst [smem:[#allocation12_spill]] %s2601_s3  ;;  %s2321_s22 = smov 0  }
   0x4   :  { %2623 = sst [smem:[#allocation13_spill]] %s2603_s5 }
   0x5   :  { %2624 = sst [smem:[#allocation14_spill]] %s2605_s7 }
   0x6   :  { %2625 = sst [smem:[#allocation15_spill]] %s2611_s13 }
   0x7   :  { %2626 = sst [smem:[#allocation16_spill]] %s2612_s14 }
   0x8   :  { %2627 = sst [smem:[#allocation17_spill]] %s2613_s15 }
   0x9 LB: > { %2628 = sst [smem:[#allocation3_spill]] %s2200_s18  ;;  %s34_s23 = sadd.s32 1, %s2208_s20  ;;  %s2216_s22 = sphi %s2321_s22, %s25_s22   ;;  %s2212_s21 = sphi %s2319_s21, %s2654_s21   ;;  %s2208_s20 = sphi %s2317_s20, %s2653_s20   ;;  %s2204_s19 = sphi %s2315_s19, %s2652_s19   ;;  %s2200_s18 = sphi %s2313_s18, %s2651_s18  }
   0xa   : > { %2629 = sst [smem:[#allocation4_spill]] %s2208_s20  ;;  %s37_s24 = sadd.s32 1, %s2212_s21 }
   0xb   : > { %2630 = sst [smem:[#allocation5_spill]] %s2212_s21  ;;  %p35_p0 = scmp.ge.s32.totalorder %s34_s23, 2 }
   0xc   : > { %2631 = sst [smem:[#allocation6_spill]] %s2216_s22  ;;  %p1893_p1 = scmp.ge.s32.totalorder %s2216_s22, 1 }
   0xd   : > { %p552_p2 = scmp.lt.s32.totalorder %s2216_s22, 5  ;;  %s2656_s23 = smov (%p35_p0, %s34_s23), 0 }
   0xe   : > { %2632 = sst [smem:[#allocation7_spill]] %s2656_s23  ;;  %s2658_s24 = smov (!%p35_p0, %s37_s24), %s2212_s21 }
   0xf   : > { %p553_p3 = pnand %p1893_p1, %p552_p2  ;;  %p39_p4 = scmp.ge.s32.totalorder %s2658_s24, 2 }
  0x11   : > { %s2660_s24 = smov (%p39_p4, %s2658_s24), 0  ;;  %556 = sbr.rel (%p553_p3) target bundleno = 3939 (0xf63), region = 80 }
  0x12   : > { %2633 = sst [smem:[#allocation8_spill]] %s2660_s24 }
  0x18   : > { %p642_p5 = scmp.lt.s32.totalorder %s2204_s19, 1  ;;  %p646_p6 = scmp.lt.s32.totalorder %s2200_s18, 1 }
  0x19   : > { %s2634_s0 = sld [smem:[#allocation10_spill]]  ;;  %s2635_s1 = sld [smem:[#allocation11_spill]] }
  0x1a   : > { %s2662_s19 = smov (!%p642_p5, %s2204_s19), 1  ;;  %s2636_s3 = sld [smem:[#allocation12_spill]] }
  0x1b   : > { %s2347_s25 = scalar_select %p646_p6, %s2200_s18, 1 }
  0x1c   : > { %s1894_s26 = sshll.u32 %s2662_s19, 3  ;;  %s2638_s5 = sld [smem:[#allocation13_spill]] }
  0x1d   : > { %s1943_s30 = sshll.u32 %s2347_s25, 4  ;;  %s1946_s21 = sshll.u32 %s2347_s25, 5 }
  0x1e   : > { %s2639_s7 = sld [smem:[#allocation14_spill]]  ;;  %s680_s27 = scalar_lea.vmem %s2607_s9, %s2347_s25 }
  0x1f   : > { %s645_s29 = scalar_lea.vmem %s2634_s0, %s1894_s26  ;;  %s650_s24 = scalar_lea.vmem %s2635_s1, %s1943_s30 }
  0x20   : > { %s2363_s13 = scalar_lea.vmem %s2636_s3, %s1943_s30  ;;  %s683_s15 = scalar_lea.vmem %s2608_s10, %s2347_s25 }
  0x21   : > { %2637 = sst [smem:[#allocation9_spill]] %s2363_s13  ;;  %s686_s1 = scalar_lea.vmem %s2609_s11, %s2347_s25 }
  0x22   : > { %s2372_s0 = scalar_lea.vmem %s2638_s5, %s1943_s30  ;;  %s689_s23 = scalar_lea.vmem %s2610_s12, %s2347_s25 }
  0x24   : > { %s2386_s13 = scalar_lea.vmem %s2639_s7, %s1946_s21  ;;  %s2640_s21 = sld [smem:[#allocation17_spill]] }
  0x25   : > { %s2641_s7 = sld [smem:[#allocation3_spill]] }
  0x2a   : > { %s2407_s22 = scalar_lea.vmem %s2640_s21, %s1894_s26 }
  0x2b   : > { %p1904_p7 = scmp.ne.s32.totalorder %s2641_s7, 0 }
  0x2c   : > { %v699_v0 = vld [vmem:[%s645_s29] sm:$0xff] (!%p1904_p7)  ;;  %vm700_vm0 = vcmask (!%p1904_p7), 261120  }
  0x2d   : > { %698 = sbr.rel (%p1904_p7) target bundleno = 52 (0x34), region = 84  ;;  %701 = vst.msk [vmem:[#allocation2] sm:$0xff] (!%p1904_p7), %vm700_vm0, %v699_v0 }
  0x34 PF: > { %v2148_v1 = vld [vmem:[%s650_s24] sm:$0xff]   ;;  %v2218_v2 = vmov 0.0   ;;  %v2149_v3 = vld [vmem:[%s650_s24 + $0x8] sm:$0xff]   ;;  %vm2219_vm1 = vmmov 0   ;;  %v2414_v4 = vld [vmem:[#allocation2] sm:$0xff]  ;;  %vm727_vm2 = vcmask 261120   ;;  %s2642_s24 = scalar_lea.vmem %s2600_s2, %s2347_s25 }
  0x35   : > { %1985 = vmatprep.subr.bf16.mxu1 %v2218_v2  ;;  %1999 = vmatprep.subr.bf16.mxu0 %v2218_v2  ;;  %v703_v5 = vpack.c.bf16 %v2414_v4, %v2414_v4  ;;  %v1905_v6 = vld [vmem:[%s2642_s24] ss:$0 sm:$0xff]  ;;  %s2220_s26 = smov 120   ;;  %s2221_s29 = smov 96   ;;  %vm775_vm3 = vcmask 64512   ;;  %vm840_vm4 = vcmask 1043456  }
  0x36   : > { %1986 = vmatpush3.bf16.msra.mxu1 %v2148_v1  ;;  %1989 = vmatprep.mubr.msk.bf16.mxu1 %vm2219_vm1, %v2218_v2  ;;  %s2222_s14 = smov 88   ;;  %s2223_s18 = smov 64   ;;  %vm1558_vm5 = vcmask 523264  }
  0x37   : > { %1987 = vmatprep.subr.bf16.mxu1 %v2218_v2  ;;  %2001 = vmatprep.mubr.msk.bf16.mxu0 %vm2219_vm1, %v2218_v2  ;;  %s2224_s19 = smov 56   ;;  %s2225_s30 = smov 112  }
  0x38   : > { %s2226_s28 = smov 80   ;;  %s2643_s16 = sld [smem:[#allocation9_spill]] }
  0x39   : > { %s2227_s17 = smov 72   ;;  %s2228_s20 = smov 104  }
  0x3a   : > { %1988 = vmatpush3.bf16.msra.mxu1 %v2149_v3  ;;  %s2229_s3 = smov 48   ;;  %s2230_s21 = smov 40  }
  0x3b   : > { %1993 = vmatprep.subr.bf16.mxu1 %v2218_v2  ;;  %s2644_s24 = scalar_lea.vmem %s2602_s4, %s2347_s25 }
  0x3d   : > { %1990 = vmatmul.mubr.msk.bf16.vlgmr.msra.gmra.mrb[0].mxu1 %vm727_vm2, %v703_v5 }
  0x3e   : > { %1995 = vmatprep.mubr.msk.bf16.mxu1 %vm2219_vm1, %v2218_v2  ;;  %v885_v52 = vld [vmem:[%s2643_s16] sm:$0xf]  ;;  %v998_v54 = vld [vmem:[%s2643_s16 + $0x4] sm:$0xf] }
  0x3f   : > { %v1049_v53 = vsel %vm840_vm4, %v885_v52, 0  ;;  %v1003_v55 = vsel %vm840_vm4, %v998_v54, 0 }
 0x110   : > { %v765_v7 = vpop.f32.mrb[0].mxu1 }
 0x111   : > { %v766_v8 = vadd.f32 %v1905_v6, %v765_v7  ;;  %v1991_v9 = vpop.f32.mrb[1].mxu1 }
 0x112   : > { %v768_v10 = vpop.f32.mrb[2].mxu1 }
 0x113   : > { %v2430_v11 = vpack.c.bf16 %v766_v8, %v766_v8  ;;  %v1992_v12 = vpop.f32.mrb[3].mxu1 }
 0x115   : > { %886 = vrot.lane.b32.xlu1 %v2430_v11, %s2220_s26  ;;  %773 = vrot.lane.b32.xlu0 %v2430_v11, %s2221_s29 }
 0x119   : > { %888 = vrot.lane.b32.xlu0 %v2430_v11, %s2222_s14 }
 0x187   : > { %v774_v13 = vpop.permute.xlu0 %773  ;;  %v887_v17 = vpop.permute.xlu1 %886 }
 0x188   : > { %v780_v14 = vsel %vm775_vm3, %v774_v13, 0 }
 0x189   : > { %1994 = vmatpush3.bf16.xpose.msra.mxu1 %v780_v14 }
 0x18a   : > { %2005 = vmatprep.subr.bf16.mxu1 %v2218_v2 }
 0x18b   : > { %v889_v15 = vpop.permute.xlu0 %888 }
 0x18c   : > { %v894_v16 = vsel %vm775_vm3, %v889_v15, 0 }
 0x190   : > { %1996 = vmatmul.mubr.msk.bf16.vlgmr.msra.gmra.mrb[4].mxu1 %vm775_vm3, %v2430_v11 }
 0x191   : > { %2006 = vmatpush3.bf16.xpose.msra.mxu1 %v894_v16  ;;  %2007 = vmatprep.mubr.msk.bf16.mxu1 %vm2219_vm1, %v2218_v2 }
 0x192   : > { %2017 = vmatprep.subr.bf16.mxu1 %v2218_v2 }
 0x198   : > { %2008 = vmatmul.mubr.msk.bf16.vlgmr.msra.gmra.mrb[8].mxu1 %vm775_vm3, %v887_v17 }
 0x199   : > { %2019 = vmatprep.mubr.msk.bf16.mxu1 %vm2219_vm1, %v2218_v2  ;;  %2018 = vmatpush3.bf16.msra.mxu1 %v1003_v55 }
 0x19a   : > { %2029 = vmatprep.subr.bf16.mxu1 %v2218_v2 }
 0x263   : > { %v816_v18 = vpop.f32.mrb[4].mxu1 }
 0x264   : > { %v822_v19 = vmul.f32 0.35355338, %v816_v18  ;;  %v1997_v20 = vpop.f32.mrb[5].mxu1 }
 0x265   : > { %v819_v21 = vpop.f32.mrb[6].mxu1 }
 0x266   : > { %v1998_v22 = vpop.f32.mrb[7].mxu1  ;;  %v823_v23 = vsel %vm775_vm3, %v822_v19, -inf }
 0x267   : > { %824 = vmax.xlane.f32.xlu1 %v823_v23 }
 0x26b   : > { %v930_v24 = vpop.f32.mrb[8].mxu1 }
 0x26c   : > { %v936_v25 = vmul.f32 0.35355338, %v930_v24  ;;  %v2009_v26 = vpop.f32.mrb[9].mxu1 }
 0x26d   : > { %v933_v27 = vpop.f32.mrb[10].mxu1 }
 0x26e   : > { %v2010_v28 = vpop.f32.mrb[11].mxu1  ;;  %v937_v29 = vsel %vm775_vm3, %v936_v25, -inf }
 0x26f   : > { %938 = vmax.xlane.f32.xlu0 %v937_v29 }
 0x2f4   : > { %v825_v30 = vpop.xlane.xlu1 %824 }
 0x2f5   : > { %v826_v31 = vsub.f32 %v822_v19, %v825_v30 }
 0x2f7   : > { %v827_v32 = vmul.f32 1.442695, %v826_v31 }
 0x2f9   : > { %2156 = vpow2.f32 %v827_v32 }
 0x2fc   : > { %v939_v33 = vpop.xlane.xlu0 %938 }
 0x2fd   : > { %v940_v34 = vsub.f32 %v936_v25, %v939_v33 }
 0x2ff   : > { %v941_v35 = vmul.f32 1.442695, %v940_v34 }
 0x301   : > { %2158 = vpow2.f32 %v941_v35 }
 0x303   : > { %v2157_v36 = vpop.eup %2156 }
 0x304   : > { %v829_v37 = vsel %vm775_vm3, %v2157_v36, 0.0 }
 0x305   : > { %830 = vadd.xlane.f32.xlu0 %v829_v37  ;;  %v1203_v37 = vld [vmem:[%s2643_s16 + $0x8] sm:$0xf] }
 0x30b   : > { %v2159_v38 = vpop.eup %2158 }
 0x30c   : > { %v943_v39 = vsel %vm775_vm3, %v2159_v38, 0.0 }
 0x30d   : > { %944 = vadd.xlane.f32.xlu1 %v943_v39 }
 0x31b   : > { %835 = vrot.lane.b32.xlu0 %v2430_v11, %s2223_s18 }
 0x31e   : > { %949 = vrot.lane.b32.xlu1 %v2430_v11, %s2224_s19  ;;  %s2645_s19 = scalar_lea.vmem %s2604_s6, %s2347_s25 }
 0x31f   : > { %1091 = vrot.lane.b32.xlu0 %v2430_v11, %s2225_s30 }
 0x322   : > { %1093 = vrot.lane.b32.xlu1 %v2430_v11, %s2226_s28  ;;  %s2646_s28 = scalar_lea.vmem %s2606_s8, %s2347_s25 }
 0x392   : > { %v831_v40 = vpop.xlane.xlu0 %830 }
 0x393   : > { %2160 = vrcp.f32 %v831_v40 }
 0x396   : > { %v836_v41 = vpop.permute.xlu0 %835 }
 0x397   : > { %v842_v42 = vsel %vm840_vm4, %v836_v41, 0 }
 0x398   : > { %2000 = vmatpush3.bf16.msra.mxu0 %v842_v42 }
 0x399   : > { %2011 = vmatprep.subr.bf16.mxu0 %v2218_v2 }
 0x39a   : > { %v945_v43 = vpop.xlane.xlu1 %944  ;;  %v1092_v6 = vpop.permute.xlu0 %1091 }
 0x39b   : > { %2162 = vrcp.f32 %v945_v43 }
 0x39d   : > { %v2161_v44 = vpop.eup %2160 }
 0x39e   : > { %v833_v45 = vmul.f32 %v2161_v44, %v2157_v36  ;;  %v950_v46 = vpop.permute.xlu1 %949 }
 0x39f   : > { %v955_v48 = vsel %vm840_vm4, %v950_v46, 0 }
 0x3a0   : > { %v834_v47 = vpack.c.bf16 %v833_v45, %v833_v45 }
 0x3a2   : > { %2002 = vmatmul.mubr.msk.bf16.vlgmr.msra.gmra.mrb[0].mxu0 %vm775_vm3, %v834_v47  ;;  %v1094_v61 = vpop.permute.xlu1 %1093 }
 0x3a3   : > { %2012 = vmatpush3.bf16.msra.mxu0 %v955_v48  ;;  %2013 = vmatprep.mubr.msk.bf16.mxu0 %vm2219_vm1, %v2218_v2  ;;  %v1099_v3 = vsel %vm775_vm3, %v1094_v61, 0 }
 0x3a4   : > { %2023 = vmatprep.subr.bf16.mxu0 %v2218_v2 }
 0x3a5   : > { %v2163_v49 = vpop.eup %2162 }
 0x3a6   : > { %v947_v50 = vmul.f32 %v2163_v49, %v2159_v38  ;;  %v1208_v38 = vsel %vm840_vm4, %v1203_v37, 0 }
 0x3a8   : > { %v948_v51 = vpack.c.bf16 %v947_v50, %v947_v50 }
 0x3aa   : > { %2014 = vmatmul.mubr.msk.bf16.vlgmr.msra.gmra.mrb[4].mxu0 %vm775_vm3, %v948_v51 }
 0x3ab   : > { %2025 = vmatprep.mubr.msk.bf16.mxu0 %vm2219_vm1, %v2218_v2  ;;  %2024 = vmatpush3.bf16.msra.mxu0 %v1049_v53 }
 0x3ac   : > { %2035 = vmatprep.subr.bf16.mxu0 %v2218_v2 }
 0x475   : > { %v878_v56 = vpop.f32.mrb[0].mxu0 }
 0x476   : > { %v884_v57 = vpack.c.bf16 %v878_v56, %v878_v56  ;;  %v2003_v58 = vpop.f32.mrb[1].mxu0 }
 0x477   : > { %v881_v59 = vpop.f32.mrb[2].mxu0 }
 0x478   : > { %v2004_v60 = vpop.f32.mrb[3].mxu0  ;;  %2026 = vmatmul.mubr.msk.bf16.vlgmr.msra.gmra.mrb[8].mxu0 %vm775_vm3, %v884_v57  ;;  %v1363_v57 = vld [vmem:[%s2643_s16 + $0xc] sm:$0xf] }
 0x479   : > { %2037 = vmatprep.mubr.msk.bf16.mxu0 %vm2219_vm1, %v2218_v2  ;;  %v1368_v58 = vsel %vm840_vm4, %v1363_v57, 0 }
 0x47d   : > { %v991_v62 = vpop.f32.mrb[4].mxu0 }
 0x47e   : > { %v997_v63 = vpack.c.bf16 %v991_v62, %v991_v62  ;;  %v2015_v0 = vpop.f32.mrb[5].mxu0 }
 0x47f   : > { %v994_v1 = vpop.f32.mrb[6].mxu0 }
 0x480   : > { %v2016_v5 = vpop.f32.mrb[7].mxu0  ;;  %2020 = vmatmul.mubr.msk.bf16.vlgmr.msra.gmra.mrb[12].mxu1 %vm775_vm3, %v997_v63 }
 0x481   : > { %2030 = vmatpush3.bf16.xpose.msra.mxu1 %v1099_v3  ;;  %2031 = vmatprep.mubr.msk.bf16.mxu1 %vm2219_vm1, %v2218_v2 }
 0x482   : > { %2041 = vmatprep.subr.bf16.mxu1 %v2218_v2 }
 0x488   : > { %2032 = vmatmul.mubr.msk.bf16.vlgmr.msra.gmra.mrb[16].mxu1 %vm775_vm3, %v1092_v6 }
 0x489   : > { %2043 = vmatprep.mubr.msk.bf16.mxu1 %vm2219_vm1, %v2218_v2  ;;  %2042 = vmatpush3.bf16.msra.mxu1 %v1208_v38  ;;  %v2154_v38 = vld [vmem:[%s2386_s13 + $0x10] sm:$0xff]  }
 0x48a   : > { %2053 = vmatprep.subr.bf16.mxu1 %v2218_v2 }
 0x54b   : > { %v1085_v7 = vpop.f32.mrb[8].mxu0 }
 0x54c   : > { %v2027_v8 = vpop.f32.mrb[9].mxu0 }
 0x54d   : > { %v1088_v9 = vpop.f32.mrb[10].mxu0 }
 0x54e   : > { %v2028_v10 = vpop.f32.mrb[11].mxu0 }
 0x553   : > { %v1039_v12 = vpop.f32.mrb[12].mxu1 }
 0x554   : > { %v2481_v13 = vadd.f32 %v1085_v7, %v1039_v12  ;;  %v2021_v14 = vpop.f32.mrb[13].mxu1  ;;  %v1921_v12 = vld [vmem:[%s2644_s24] ss:$0 sm:$0xff] }
 0x555   : > { %v1042_v15 = vpop.f32.mrb[14].mxu1 }
 0x556   : > { %v2022_v16 = vpop.f32.mrb[15].mxu1 }
 0x55b   : > { %v1135_v17 = vpop.f32.mrb[16].mxu1 }
 0x55c   : > { %v1141_v18 = vmul.f32 0.35355338, %v1135_v17  ;;  %v2033_v19 = vpop.f32.mrb[17].mxu1 }
 0x55d   : > { %v1138_v20 = vpop.f32.mrb[18].mxu1 }
 0x55e   : > { %v2034_v21 = vpop.f32.mrb[19].mxu1  ;;  %v1142_v22 = vsel %vm775_vm3, %v1141_v18, -inf }
 0x55f   : > { %1143 = vmax.xlane.f32.xlu1 %v1142_v22 }
 0x570   : > { %1253 = vrot.lane.b32.xlu1 %v2430_v11, %s2227_s17 }
 0x574   : > { %1251 = vrot.lane.b32.xlu1 %v2430_v11, %s2228_s20 }
 0x5ec   : > { %v1144_v23 = vpop.xlane.xlu1 %1143 }
 0x5ed   : > { %v1145_v24 = vsub.f32 %v1141_v18, %v1144_v23 }
 0x5ef   : > { %v1146_v25 = vmul.f32 1.442695, %v1145_v24 }
 0x5f0   : > { %v1254_v33 = vpop.permute.xlu1 %1253 }
 0x5f1   : > { %2164 = vpow2.f32 %v1146_v25  ;;  %v1259_v35 = vsel %vm775_vm3, %v1254_v33, 0  ;;  %v2150_v25 = vld [vmem:[%s2372_s0] sm:$0xff]  }
 0x5f4   : > { %v1252_v36 = vpop.permute.xlu1 %1251 }
 0x5fb   : > { %v2165_v26 = vpop.eup %2164 }
 0x5fc   : > { %v1148_v27 = vsel %vm775_vm3, %v2165_v26, 0.0 }
 0x5fd   : > { %1149 = vadd.xlane.f32.xlu0 %v1148_v27  ;;  %v2153_v27 = vld [vmem:[%s2386_s13 + $0x8] sm:$0xff]  }
 0x613   : > { %1154 = vrot.lane.b32.xlu0 %v2430_v11, %s2229_s3  ;;  %s2647_s3 = sld [smem:[#allocation3_spill]] }
 0x619   : > { %p1936_p8 = scmp.ne.s32.totalorder %s2647_s3, 1 }
 0x61a   : > { %s2648_s7 = sld [smem:[#allocation15_spill]] (!%p1936_p8)  ;;  %vm2232_vm6 = vmmov (!%p1936_p8), 0  }
 0x68a   : > { %v1150_v28 = vpop.xlane.xlu0 %1149 }
 0x68b   : > { %2166 = vrcp.f32 %v1150_v28 }
 0x68e   : > { %v1155_v29 = vpop.permute.xlu0 %1154 }
 0x68f   : > { %v1160_v30 = vsel %vm840_vm4, %v1155_v29, 0 }
 0x690   : > { %2036 = vmatpush3.bf16.msra.mxu0 %v1160_v30 }
 0x691   : > { %2047 = vmatprep.subr.bf16.mxu0 %v2218_v2 }
 0x695   : > { %v2167_v31 = vpop.eup %2166 }
 0x696   : > { %v1152_v32 = vmul.f32 %v2167_v31, %v2165_v26  ;;  %v2151_v26 = vld [vmem:[%s2372_s0 + $0x8] sm:$0xff]   ;;  %s2649_s0 = sld [smem:[#allocation16_spill]] (!%p1936_p8) }
 0x698   : > { %v1153_v34 = vpack.c.bf16 %v1152_v32, %v1152_v32  ;;  %v1922_v32 = vld [vmem:[%s680_s27] ss:$0 sm:$0xff] }
 0x69a   : > { %2038 = vmatmul.mubr.msk.bf16.vlgmr.msra.gmra.mrb[12].mxu0 %vm775_vm3, %v1153_v34  ;;  %v1923_v34 = vld [vmem:[%s683_s15] ss:$0 sm:$0xff] }
 0x69b   : > { %2048 = vmatpush3.bf16.xpose.msra.mxu0 %v1259_v35  ;;  %2049 = vmatprep.mubr.msk.bf16.mxu0 %vm2219_vm1, %v2218_v2 }
 0x69c   : > { %2059 = vmatprep.subr.bf16.mxu0 %v2218_v2 }
 0x6a2   : > { %2050 = vmatmul.mubr.msk.bf16.vlgmr.msra.gmra.mrb[16].mxu0 %vm775_vm3, %v1252_v36 }
 0x6a3   : > { %2061 = vmatprep.mubr.msk.bf16.mxu0 %vm2219_vm1, %v2218_v2  ;;  %2060 = vmatpush3.bf16.msra.mxu0 %v1368_v58 }
 0x6a4   : > { %2073 = vmatprep.subr.bf16.mxu0 %v2218_v2 }
 0x76d   : > { %v1196_v39 = vpop.f32.mrb[12].mxu0 }
 0x76e   : > { %v1202_v40 = vpack.c.bf16 %v1196_v39, %v1196_v39  ;;  %v2039_v41 = vpop.f32.mrb[13].mxu0  ;;  %v2155_v39 = vld [vmem:[%s2386_s13 + $0x18] sm:$0xff]  }
 0x76f   : > { %v1199_v42 = vpop.f32.mrb[14].mxu0 }
 0x770   : > { %v2040_v43 = vpop.f32.mrb[15].mxu0  ;;  %2044 = vmatmul.mubr.msk.bf16.vlgmr.msra.gmra.mrb[20].mxu1 %vm775_vm3, %v1202_v40  ;;  %v1924_v40 = vld [vmem:[%s2645_s19] ss:$0 sm:$0xff] }
 0x771   : > { %2055 = vmatprep.mubr.msk.bf16.mxu1 %vm2219_vm1, %v2218_v2 }
 0x775   : > { %v1295_v44 = vpop.f32.mrb[16].mxu0 }
 0x776   : > { %v1301_v45 = vmul.f32 0.35355338, %v1295_v44  ;;  %v2051_v46 = vpop.f32.mrb[17].mxu0 }
 0x777   : > { %v1298_v47 = vpop.f32.mrb[18].mxu0 }
 0x778   : > { %v2052_v48 = vpop.f32.mrb[19].mxu0  ;;  %v1302_v49 = vsel %vm775_vm3, %v1301_v45, -inf }
 0x779   : > { %1303 = vmax.xlane.f32.xlu0 %v1302_v49 }
 0x78f   : > { %1314 = vrot.lane.b32.xlu0 %v2430_v11, %s2230_s21 }
 0x806   : > { %v1304_v50 = vpop.xlane.xlu0 %1303 }
 0x807   : > { %v1305_v51 = vsub.f32 %v1301_v45, %v1304_v50 }
 0x809   : > { %v1306_v52 = vmul.f32 1.442695, %v1305_v51 }
 0x80a   : > { %v1315_v53 = vpop.permute.xlu0 %1314 }
 0x80b   : > { %2168 = vpow2.f32 %v1306_v52  ;;  %v1320_v54 = vsel %vm840_vm4, %v1315_v53, 0 }
 0x80c   : > { %2054 = vmatpush3.bf16.msra.mxu1 %v1320_v54 }
 0x80d   : > { %2065 = vmatprep.subr.bf16.mxu1 %v2218_v2 }
 0x815   : > { %v2169_v55 = vpop.eup %2168 }
 0x816   : > { %v1308_v56 = vsel %vm775_vm3, %v2169_v55, 0.0 }
 0x817   : > { %1309 = vadd.xlane.f32.xlu1 %v1308_v56 }
 0x843   : > { %v1244_v11 = vpop.f32.mrb[20].mxu1 }
 0x844   : > { %v1250_v59 = vadd.f32 %v1244_v11, %v2481_v13  ;;  %v2045_v60 = vpop.f32.mrb[21].mxu1 }
 0x845   : > { %v1247_v61 = vpop.f32.mrb[22].mxu1 }
 0x846   : > { %v2046_v62 = vpop.f32.mrb[23].mxu1 }
 0x8a4   : > { %v1310_v63 = vpop.xlane.xlu1 %1309 }
 0x8a5   : > { %2170 = vrcp.f32 %v1310_v63  ;;  %v1934_v63 = vld [vmem:[%s686_s1] ss:$0 sm:$0xff] }
 0x8af   : > { %v2171_v0 = vpop.eup %2170 }
 0x8b0   : > { %v1312_v1 = vmul.f32 %v2171_v0, %v2169_v55 }
 0x8b2   : > { %v1313_v3 = vpack.c.bf16 %v1312_v1, %v1312_v1  ;;  %v1935_v1 = vld [vmem:[%s689_s23] ss:$0 sm:$0xff] }
 0x8b4   : > { %2056 = vmatmul.mubr.msk.bf16.vlgmr.msra.gmra.mrb[24].mxu1 %vm775_vm3, %v1313_v3 }
 0x8b5   : > { %2069 = vmatprep.mubr.msk.bf16.mxu1 %vm2219_vm1, %v2218_v2  ;;  %2066 = vmatpush3.bf16.msra.mxu1 %v2150_v25 }
 0x8b6   : > { %2067 = vmatprep.subr.bf16.mxu1 %v2218_v2 }
 0x8b9   : > { %2068 = vmatpush3.bf16.msra.mxu1 %v2151_v26 }
 0x987   : > { %v1356_v5 = vpop.f32.mrb[24].mxu1 }
 0x988   : > { %v1362_v6 = vpack.c.bf16 %v1356_v5, %v1356_v5  ;;  %v2057_v7 = vpop.f32.mrb[25].mxu1 }
 0x989   : > { %v1359_v8 = vpop.f32.mrb[26].mxu1  ;;  %v2231_v7 = vmov (!%p1936_p8), 0.0  }
 0x98a   : > { %v2058_v9 = vpop.f32.mrb[27].mxu1  ;;  %2062 = vmatmul.mubr.msk.bf16.vlgmr.msra.gmra.mrb[20].mxu0 %vm775_vm3, %v1362_v6  ;;  %v2176_v6 = vld [vmem:[%s2648_s7] sm:$0xff] (!%p1936_p8)   ;;  %v2177_v8 = vld [vmem:[%s2648_s7 + $0x8] sm:$0xff] (!%p1936_p8)  }
 0x98b   : > { %2081 = vmatprep.mubr.msk.bf16.mxu0 %vm2219_vm1, %v2218_v2 }
 0xa5d   : > { %v1404_v10 = vpop.f32.mrb[20].mxu0 }
 0xa5e   : > { %v1410_v13 = vadd.f32 %v1404_v10, %v1250_v59  ;;  %v2063_v14 = vpop.f32.mrb[21].mxu0  ;;  %v1937_v10 = vld [vmem:[%s2649_s0] ss:$0 sm:$0xff] (!%p1936_p8) }
 0xa5f   : > { %v1407_v15 = vpop.f32.mrb[22].mxu0 }
 0xa60   : > { %v1418_v16 = vadd.f32 %v1921_v12, %v1410_v13  ;;  %v2064_v17 = vpop.f32.mrb[23].mxu0 }
 0xa62   : > { %v1419_v18 = vadd.f32 %v1418_v16, %v2414_v4  ;;  %v2152_v4 = vld [vmem:[%s2386_s13] sm:$0xff]  }
 0xa63   : > { %2074 = vmatpush3.bf16.msra.mxu0 %v2152_v4 }
 0xa64   : > { %v1422_v19 = vsel %vm727_vm2, %v1419_v18, 0.0  ;;  %2075 = vmatprep.subr.bf16.mxu0 %v2218_v2 }
 0xa65   : > { %1423 = vadd.xlane.f32.xlu1 %v1422_v19 }
 0xa67   : > { %2076 = vmatpush3.bf16.msra.mxu0 %v2153_v27 }
 0xa68   : > { %2077 = vmatprep.subr.bf16.mxu0 %v2218_v2 }
 0xa6b   : > { %2078 = vmatpush3.bf16.msra.mxu0 %v2154_v38 }
 0xa6c   : > { %2079 = vmatprep.subr.bf16.mxu0 %v2218_v2  ;;  %v1928_v2 = vld [vmem:[%s2646_s28] ss:$0 sm:$0xff] }
 0xa6f   : > { %2080 = vmatpush3.bf16.msra.mxu0 %v2155_v39 }
 0xa70   : > { %2085 = vmatprep.subr.bf16.mxu0 (!%p1936_p8), %v2231_v7 }
 0xaf2   : > { %v1424_v20 = vpop.xlane.xlu1 %1423 }
 0xaf3   : > { %v1426_v21 = vmul.f32 0.03125, %v1424_v20 }
 0xaf5   : > { %v1427_v22 = vsub.f32 %v1419_v18, %v1426_v21 }
 0xaf7   : > { %v1428_v23 = vmul.f32 %v1427_v22, %v1427_v22 }
 0xaf9   : > { %v1429_v24 = vsel %vm727_vm2, %v1428_v23, 0.0 }
 0xafa   : > { %1430 = vadd.xlane.f32.xlu1 %v1429_v24 }
 0xb87   : > { %v1431_v28 = vpop.xlane.xlu1 %1430 }
 0xb88   : > { %v1432_v29 = vmul.f32 0.03125, %v1431_v28 }
 0xb8a   : > { %v1433_v30 = vadd.f32 1e-05, %v1432_v29 }
 0xb8c   : > { %2172 = vrsqrt.f32 %v1433_v30 }
 0xb96   : > { %v2173_v31 = vpop.eup %2172 }
 0xb97   : > { %v1435_v33 = vmul.f32 %v2173_v31, %v1427_v22 }
 0xb99   : > { %v1442_v35 = vmul.f32 %v1922_v32, %v1435_v33 }
 0xb9b   : > { %v1449_v36 = vadd.f32 %v1923_v34, %v1442_v35 }
 0xb9d   : > { %v1450_v37 = vpack.c.bf16 %v1449_v36, %v1449_v36 }
 0xb9f   : > { %2070 = vmatmul.mubr.msk.bf16.vlgmr.msra.gmra.mrb[28].mxu1 %vm727_vm2, %v1450_v37 }
 0xc72   : > { %v1511_v41 = vpop.f32.mrb[28].mxu1 }
 0xc73   : > { %v1512_v42 = vadd.f32 %v1924_v40, %v1511_v41  ;;  %v2071_v43 = vpop.f32.mrb[29].mxu1 }
 0xc74   : > { %v1514_v44 = vpop.f32.mrb[30].mxu1 }
 0xc75   : > { %v1517_v45 = vmax.f32 %v1512_v42, 0.0  ;;  %v2072_v46 = vpop.f32.mrb[31].mxu1 }
 0xc77   : > { %v1518_v47 = vpack.c.bf16 %v1517_v45, %v1517_v45 }
 0xc79   : > { %2082 = vmatmul.mubr.msk.bf16.vlgmr.msra.gmra.mrb[24].mxu0 %vm1558_vm5, %v1518_v47 }
 0xc7a   : > { %2086 = vmatpush3.bf16.msra.mxu0 (!%p1936_p8), %v2176_v6  ;;  %2089 = vmatprep.mubr.msk.bf16.mxu0 (!%p1936_p8), %vm2232_vm6, %v2231_v7 }
 0xc7b   : > { %2087 = vmatprep.subr.bf16.mxu0 (!%p1936_p8), %v2231_v7 }
 0xc7e   : > { %2088 = vmatpush3.bf16.msra.mxu0 (!%p1936_p8), %v2177_v8 }
 0xd4c   : > { %v1596_v48 = vpop.f32.mrb[24].mxu0 }
 0xd4d   : > { %v1597_v49 = vadd.f32 %v1928_v2, %v1596_v48  ;;  %v2083_v50 = vpop.f32.mrb[25].mxu0 }
 0xd4e   : > { %v1599_v51 = vpop.f32.mrb[26].mxu0 }
 0xd4f   : > { %v2084_v52 = vpop.f32.mrb[27].mxu0  ;;  %v1602_v53 = vadd.f32 %v1597_v49, %v1449_v36 }
 0xd51   : > { %v1605_v54 = vsel %vm727_vm2, %v1602_v53, 0.0 }
 0xd52   : > { %1606 = vadd.xlane.f32.xlu1 %v1605_v54 }
 0xddf   : > { %v1607_v55 = vpop.xlane.xlu1 %1606 }
 0xde0   : > { %v1608_v56 = vmul.f32 0.03125, %v1607_v55 }
 0xde2   : > { %v1609_v57 = vsub.f32 %v1602_v53, %v1608_v56 }
 0xde4   : > { %v1610_v58 = vmul.f32 %v1609_v57, %v1609_v57 }
 0xde6   : > { %v1611_v11 = vsel %vm727_vm2, %v1610_v58, 0.0 }
 0xde7   : > { %1612 = vadd.xlane.f32.xlu1 %v1611_v11 }
 0xe74   : > { %v1613_v59 = vpop.xlane.xlu1 %1612 }
 0xe75   : > { %v1614_v60 = vmul.f32 0.03125, %v1613_v59 }
 0xe77   : > { %v1615_v61 = vadd.f32 1e-05, %v1614_v60 }
 0xe79   : > { %2174 = vrsqrt.f32 %v1615_v61 }
 0xe83   : > { %v2175_v62 = vpop.eup %2174 }
 0xe84   : > { %v1617_v0 = vmul.f32 %v2175_v62, %v1609_v57  ;;  %1636 = sbr.rel (%p1936_p8) target bundleno = 3939 (0xf63), region = 88 }
 0xe86   : > { %v1624_v3 = vmul.f32 %v1934_v63, %v1617_v0 }
 0xe88   : > { %v1631_v5 = vadd.f32 %v1935_v1, %v1624_v3 }
 0xe8a   : > { %1632 = vst.msk [vmem:[#allocation2] sm:$0xff] %vm727_vm2, %v1631_v5  ;;  %v1637_v9 = vpack.c.bf16 (!%p1936_p8), %v1631_v5, %v1631_v5 }
 0xe8c   : > { %2090 = vmatmul.mubr.msk.bf16.vlgmr.msra.gmra.mrb[0].mxu0 %vm727_vm2, %v1637_v9 }
 0xf5f   : > { %v1698_v12 = vpop.f32.mrb[0].mxu0 }
 0xf60   : > { %v1699_v13 = vadd.f32 %v1937_v10, %v1698_v12  ;;  %v2091_v14 = vpop.f32.mrb[1].mxu0 }
 0xf61   : > { %v1701_v15 = vpop.f32.mrb[2].mxu0 }
 0xf62   : > { %1704 = vst [vmem:[%s2407_s22] sm:$0xff] %v1699_v13  ;;  %v2092_v16 = vpop.f32.mrb[3].mxu0 }
 0xf63 PF: > { %s2650_s26 = sld [smem:[#allocation6_spill]]  ;;  %s2651_s18 = sld [smem:[#allocation4_spill]] }
 0xf64   : > { %s2652_s19 = sld [smem:[#allocation5_spill]]  ;;  %s2653_s20 = sld [smem:[#allocation7_spill]] }
 0xf65   : > { %s2654_s21 = sld [smem:[#allocation8_spill]] }
 0xf69   : > { %s25_s22 = sadd.s32 1, %s2650_s26  }
 0xf6a   : > { %p22_p9 = scmp.ge.s32.totalorder %s25_s22, 6  }
 0xf6c   :  { %24 = sbr.rel (!%p22_p9) target bundleno = 9 (0x9), region = 154 }

</bundles_post_ra>
